<compile_context>
chip_gen: v7x
topology: tpu7x:2x2x1
jax: 0.10.0
libtpu: 0.0.40
codegen_flags: <defaults>
</compile_context>

<pallas_src>
import functools

import jax
import jax.numpy as jnp
from jax.experimental import pallas as pl
from jax.experimental.pallas import tpu as pltpu

_LANES = 128
_SUBLANES = 8


def _round_up(x, m):
    return (x + m - 1) // m * m


# ----------------------------- kernels ------------------------------------- #

def gcn_layer1_kernel(a_ref, x_ref, w1_ref, b1_ref, h_ref):
    # Re-associated order: (A @ X) @ W1.
    #   - the N^2 aggregation matmul runs at width F_IN (<= HIDDEN)
    #   - under row tiling, X @ W1 would otherwise be recomputed per tile
    ax = jnp.dot(a_ref[...], x_ref[...], preferred_element_type=jnp.float32)
    h = jnp.dot(ax.astype(jnp.bfloat16), w1_ref[...],
                preferred_element_type=jnp.float32)
    h = jnp.maximum(h + b1_ref[...], 0.0)
    # TODO(synk): training-mode dropout (p=0.5) would use pltpu.prng_seed /
    # pltpu.prng_random_bits; inference (identity) semantics implemented here.
    h_ref[...] = h.astype(h_ref.dtype)


def gcn_layer2_kernel(a_ref, h_ref, w2_ref, b2_ref, out_ref, *, num_classes):
    # (A @ H) @ W2 (avoids recomputing H @ W2 for every row tile).
    ah = jnp.dot(a_ref[...], h_ref[...], preferred_element_type=jnp.float32)
    o = jnp.dot(ah.astype(jnp.bfloat16), w2_ref[...],
                preferred_element_type=jnp.float32)
    o = o + b2_ref[...]

    # Lane-dense (tm, 128) logits: mask the padded class lanes before the
    # log_softmax reduction so they contribute nothing.
    lane = jax.lax.broadcasted_iota(jnp.int32, o.shape, dimension=1)
    o = jnp.where(lane < num_classes, o, -1e30)

    m = jnp.max(o, axis=1, keepdims=True)
    s = o - m
    lse = jnp.log(jnp.sum(jnp.exp(s), axis=1, keepdims=True))
    out_ref[...] = (s - lse).astype(out_ref.dtype)


# ------------------------------ glue ---------------------------------------- #

def build_normalized_adjacency(edge_index, n, n_pad, dtype=jnp.bfloat16):
    """Dense D^-1/2 (A + I_remaining) D^-1/2, PyG gcn_norm semantics.

    Degrees come from an O(E) segment-sum (duplicate edges are summed, existing
    self-loops kept, missing ones added), and the normalization is folded into
    the scatter so the N^2 adjacency is materialized exactly once.
    """
    src = edge_index[0].astype(jnp.int32)
    dst = edge_index[1].astype(jnp.int32)
    e_w = jnp.ones(src.shape, jnp.float32)

    deg = jnp.zeros((n,), jnp.float32).at[dst].add(e_w)
    has_self = jnp.zeros((n,), jnp.float32).at[dst].add(
        jnp.where(src == dst, 1.0, 0.0))
    needs_self = (has_self == 0.0).astype(jnp.float32)
    deg = deg + needs_self                      # add_remaining_self_loops
    d_inv_sqrt = jnp.where(deg > 0.0, jax.lax.rsqrt(deg), 0.0)

    w = d_inv_sqrt[dst] * d_inv_sqrt[src] * e_w
    a = jnp.zeros((n_pad, n_pad), jnp.float32).at[dst, src].add(w)
    idx = jnp.arange(n)
    a = a.at[idx, idx].add(needs_self * d_inv_sqrt * d_inv_sqrt)
    return a.astype(dtype)


def gcn_forward(x, edge_index, w1, b1, w2, b2, *, row_tile=None):
    n, f_in = x.shape
    hidden = w1.shape[1]
    num_classes = w2.shape[1]

    # Pad feature / hidden / class dims to full lane width (128): full-width MXU
    # output tiles and unmasked lane-dense stores; padding is zeros so results
    # in the real columns are unchanged.
    f_pad = _round_up(f_in, _LANES)
    h_pad = _round_up(hidden, _LANES)
    c_pad = _round_up(num_classes, _LANES)

    # Row tile over nodes: small graphs run as one full-height tile; large
    # graphs use 256-row tiles (good measured tile size, fits 64 MiB v7x VMEM
    # with double-buffered bf16 (tm x N) blocks plus resident weights).
    if row_tile is None:
        row_tile = _round_up(n, _SUBLANES) if n <= 512 else 256
    n_pad = _round_up(n, row_tile)
    num_tiles = n_pad // row_tile

    a_norm = build_normalized_adjacency(edge_index, n, n_pad, jnp.bfloat16)

    x_p = jnp.zeros((n_pad, f_pad), jnp.bfloat16).at[:n, :f_in].set(
        x.astype(jnp.bfloat16))
    w1_p = jnp.zeros((f_pad, h_pad), jnp.bfloat16).at[:f_in, :hidden].set(
        w1.astype(jnp.bfloat16))
    b1_p = jnp.zeros((1, h_pad), jnp.float32).at[0, :hidden].set(
        b1.astype(jnp.float32))
    w2_p = jnp.zeros((h_pad, c_pad), jnp.bfloat16).at[:hidden, :num_classes].set(
        w2.astype(jnp.bfloat16))
    b2_p = jnp.zeros((1, c_pad), jnp.float32).at[0, :num_classes].set(
        b2.astype(jnp.float32))

    cparams = pltpu.CompilerParams(
        dimension_semantics=("parallel",),       # row tiles are independent
        vmem_limit_bytes=64 * 1024 * 1024,       # raise scoped limit (<= v7x HW)
    )

    # ---- layer 1: H = ReLU(A_norm @ X @ W1 + b1), dropout = identity (eval) ----
    h = pl.pallas_call(
        gcn_layer1_kernel,
        out_shape=jax.ShapeDtypeStruct((n_pad, h_pad), jnp.bfloat16),
        grid=(num_tiles,),
        in_specs=[
            pl.BlockSpec((row_tile, n_pad), lambda i: (i, 0)),   # A row tile
            pl.BlockSpec((n_pad, f_pad), lambda i: (0, 0)),      # X resident
            pl.BlockSpec((f_pad, h_pad), lambda i: (0, 0)),      # W1 resident
            pl.BlockSpec((1, h_pad), lambda i: (0, 0)),          # b1 resident
        ],
        out_specs=pl.BlockSpec((row_tile, h_pad), lambda i: (i, 0)),
        compiler_params=cparams,
    )(a_norm, x_p, w1_p, b1_p)

    # ---- layer 2 + log_softmax: log_softmax(A_norm @ H @ W2 + b2) ----
    out_p = pl.pallas_call(
        functools.partial(gcn_layer2_kernel, num_classes=num_classes),
        out_shape=jax.ShapeDtypeStruct((n_pad, c_pad), jnp.float32),
        grid=(num_tiles,),
        in_specs=[
            pl.BlockSpec((row_tile, n_pad), lambda i: (i, 0)),   # A row tile
            pl.BlockSpec((n_pad, h_pad), lambda i: (0, 0)),      # H resident
            pl.BlockSpec((h_pad, c_pad), lambda i: (0, 0)),      # W2 resident
            pl.BlockSpec((1, c_pad), lambda i: (0, 0)),          # b2 resident
        ],
        out_specs=pl.BlockSpec((row_tile, c_pad), lambda i: (i, 0)),
        compiler_params=cparams,
    )(a_norm, h, w2_p, b2_p)

    # Slice away node-row padding and class-lane padding.
    return out_p[:n, :num_classes]


# TODO(synk): for genuinely large sparse graphs, replace the dense A_norm matmul
# with a PrefetchScalarGridSpec block-sparse neighbor-gather design (O(E) not O(N^2)).


# --------------------------- pure-JAX reference ----------------------------- #

def reference_forward(x, edge_index, w1, b1, w2, b2):
    n = x.shape[0]
    src, dst = edge_index[0], edge_index[1]
    adj = jnp.zeros((n, n), jnp.float32).at[dst, src].add(1.0)   # sum duplicates
    diag = jnp.diagonal(adj)
    adj = adj + jnp.diag(jnp.where(diag == 0.0, 1.0, 0.0))       # remaining self-loops
    deg = adj.sum(axis=1)
    d = jnp.where(deg > 0.0, 1.0 / jnp.sqrt(deg), 0.0)
    a_norm = d[:, None] * adj * d[None, :]
    h = jnp.maximum(a_norm @ (x @ w1) + b1, 0.0)
    o = a_norm @ (h @ w2) + b2
    return jax.nn.log_softmax(o, axis=1)


# --------------------------------- demo -------------------------------------- #

if __name__ == "__main__":
    N = 8          # nodes
    F_IN = 16      # init_feature_dim
    HIDDEN = 32    # hidden_channels
    CLASSES = 4    # num_classes

    key = jax.random.PRNGKey(0)
    k_x, k_w1, k_w2 = jax.random.split(key, 3)

    x = jax.random.normal(k_x, (N, F_IN), dtype=jnp.float32)

    # undirected ring graph (both directions) -> edge_index [2, 2N]
    idx = jnp.arange(N, dtype=jnp.int32)
    nxt = (idx + 1) % N
    edge_index = jnp.stack(
        [jnp.concatenate([idx, nxt]), jnp.concatenate([nxt, idx])], axis=0
    )

    w1 = jax.random.normal(k_w1, (F_IN, HIDDEN), dtype=jnp.float32) * (
        1.0 / jnp.sqrt(F_IN))
    b1 = jnp.zeros((HIDDEN,), dtype=jnp.float32)
    w2 = jax.random.normal(k_w2, (HIDDEN, CLASSES), dtype=jnp.float32) * (
        1.0 / jnp.sqrt(HIDDEN))
    b2 = jnp.zeros((CLASSES,), dtype=jnp.float32)

    out = gcn_forward(x, edge_index, w1, b1, w2, b2)
    out = jax.block_until_ready(out)

    ref = reference_forward(x, edge_index, w1, b1, w2, b2)
    assert out.shape == (N, CLASSES)
    # bf16 matmul operands (f32 accumulation) -> relaxed tolerance vs f32 reference
    assert jnp.allclose(out, ref, atol=5e-2, rtol=5e-2), (
        float(jnp.max(jnp.abs(out - ref))))

    print("KERNEL_OK")
</pallas_src>

<mosaic_0001>
module attributes {stable_mosaic.version = 11 : i64} {
  func.func @gcn_layer1_kernel(%arg0: i32, %arg1: memref<8x8xbf16, #tpu.memory_space<vmem>>, %arg2: memref<8x128xbf16, #tpu.memory_space<vmem>>, %arg3: memref<128x128xbf16, #tpu.memory_space<vmem>>, %arg4: memref<1x128xf32, #tpu.memory_space<vmem>>, %arg5: memref<8x128xbf16, #tpu.memory_space<vmem>>) attributes {dimension_semantics = [#tpu.dimension_semantics<parallel>], iteration_bounds = array<i64: 1>, scalar_prefetch = 0 : i64, scratch_operands = 0 : i64, tpu.core_type = #tpu.core_type<tc>, window_params = [{transform_indices = @transform_0, window_bounds = array<i64: 8, 8>}, {pipeline_mode = #tpu.pipeline_mode<synchronous>, transform_indices = @transform_1, window_bounds = array<i64: 8, 128>}, {pipeline_mode = #tpu.pipeline_mode<synchronous>, transform_indices = @transform_2, window_bounds = array<i64: 128, 128>}, {pipeline_mode = #tpu.pipeline_mode<synchronous>, transform_indices = @transform_3, window_bounds = array<i64: 1, 128>}, {transform_indices = @transform_4, window_bounds = array<i64: 8, 128>}]} {
    %c0 = arith.constant 0 : index
    %c0_0 = arith.constant 0 : index
    %0 = vector.load %arg1[%c0, %c0_0] : memref<8x8xbf16, #tpu.memory_space<vmem>>, vector<8x8xbf16>
    %c0_1 = arith.constant 0 : index
    %c0_2 = arith.constant 0 : index
    %1 = vector.load %arg2[%c0_1, %c0_2] : memref<8x128xbf16, #tpu.memory_space<vmem>>, vector<8x128xbf16>
    %cst = arith.constant dense<0.000000e+00> : vector<8x128xf32>
    %2 = tpu.matmul %0, %1, %cst {dimension_numbers = #tpu.dot_dimension_numbers<[1], [0], [0], [1], [0, 0, 1, 1], [], []>} : vector<8x8xbf16>, vector<8x128xbf16>, vector<8x128xf32> -> vector<8x128xf32>
    %3 = arith.truncf %2 : vector<8x128xf32> to vector<8x128xbf16>
    %c0_3 = arith.constant 0 : index
    %c0_4 = arith.constant 0 : index
    %4 = vector.load %arg3[%c0_3, %c0_4] : memref<128x128xbf16, #tpu.memory_space<vmem>>, vector<128x128xbf16>
    %cst_5 = arith.constant dense<0.000000e+00> : vector<8x128xf32>
    %5 = tpu.matmul %3, %4, %cst_5 {dimension_numbers = #tpu.dot_dimension_numbers<[1], [0], [0], [1], [0, 0, 1, 1], [], []>} : vector<8x128xbf16>, vector<128x128xbf16>, vector<8x128xf32> -> vector<8x128xf32>
    %c0_6 = arith.constant 0 : index
    %c0_7 = arith.constant 0 : index
    %6 = vector.load %arg4[%c0_6, %c0_7] : memref<1x128xf32, #tpu.memory_space<vmem>>, vector<1x128xf32>
    %7 = vector.broadcast %6 : vector<1x128xf32> to vector<8x128xf32>
    %8 = arith.addf %5, %7 : vector<8x128xf32>
    %cst_8 = arith.constant 0.000000e+00 : f32
    %9 = vector.broadcast %cst_8 : f32 to vector<8x128xf32>
    %10 = arith.maximumf %8, %9 : vector<8x128xf32>
    %11 = arith.truncf %10 : vector<8x128xf32> to vector<8x128xbf16>
    %c0_9 = arith.constant 0 : index
    %c0_10 = arith.constant 0 : index
    %12 = vector.load %arg5[%c0_9, %c0_10] : memref<8x128xbf16, #tpu.memory_space<vmem>>, vector<8x128xbf16>
    tpu.vector_store %arg5[%c0_9, %c0_10], %11 {strides = array<i32>} : memref<8x128xbf16, #tpu.memory_space<vmem>>, vector<8x128xbf16>,
    return
  }
  func.func @transform_0(%arg0: i32) -> (i32, i32) {
    %c0_i32 = arith.constant 0 : i32
    %c0_i32_0 = arith.constant 0 : i32
    return %arg0, %c0_i32 : i32, i32
  }
  func.func @transform_1(%arg0: i32) -> (i32, i32) {
    %c0_i32 = arith.constant 0 : i32
    %c0_i32_0 = arith.constant 0 : i32
    %c0_i32_1 = arith.constant 0 : i32
    return %c0_i32, %c0_i32_0 : i32, i32
  }
  func.func @transform_2(%arg0: i32) -> (i32, i32) {
    %c0_i32 = arith.constant 0 : i32
    %c0_i32_0 = arith.constant 0 : i32
    %c0_i32_1 = arith.constant 0 : i32
    return %c0_i32, %c0_i32_0 : i32, i32
  }
  func.func @transform_3(%arg0: i32) -> (i32, i32) {
    %c0_i32 = arith.constant 0 : i32
    %c0_i32_0 = arith.constant 0 : i32
    %c0_i32_1 = arith.constant 0 : i32
    return %c0_i32, %c0_i32_0 : i32, i32
  }
  func.func @transform_4(%arg0: i32) -> (i32, i32) {
    %c0_i32 = arith.constant 0 : i32
    %c0_i32_0 = arith.constant 0 : i32
    return %arg0, %c0_i32 : i32, i32
  }
}

</mosaic_0001>

<bundles_post_ra>
// kernel: tpu_custom_call.1
= control target key start
LH: loop header
LB: loop body
LE: loop exit
PB: predicated region body
PF: predicated region fallthrough
CT: control target
= control target key end

     0   :  { %9 = vsyncpa [#allocation3], 0  ;;  %s526_s0 = inlined_call_operand.hbm [shape: bf16[8,8], index: 0, kind: input, shape index: {}]   ;;  %s527_s1 = inlined_call_operand.hbm [shape: bf16[8,128], index: 1, kind: input, shape index: {}]   ;;  %s528_s2 = inlined_call_operand.hbm [shape: bf16[128,128], index: 2, kind: input, shape index: {}]   ;;  %s529_s3 = inlined_call_operand.hbm [shape: f32[1,128], index: 3, kind: input, shape index: {}]   ;;  %s530_s4 = inlined_call_operand.hbm [shape: bf16[8,128], index: 4, kind: output, shape index: {}]  }
   0x1   :  { %10 = vsyncpa [#allocation6], 0 }
   0x2   :  { %11 = vsyncpa [#allocation9], 0 }
   0x3   :  { %12 = vsyncpa [#allocation4], 0  ;;  %s432_s15 = smov [#allocation5]   ;;  %s433_s17 = smov [#allocation2]  }
   0x4   :  { %s29_s16 = sshll.u32 %s432_s15, 4  ;;  %s19_s18 = sshll.u32 %s433_s17, 4  ;;  %s30_s16 = int_to_ptr.vmem [resolvable:$true] %s29_s16  ;;  %s20_s18 = int_to_ptr.vmem [resolvable:$true] %s19_s18 }
   0x5   :  { %s314_s21 = scalar_lea.hbm %s527_s1, 64 }
   0x6   :  { %p315_p0 = scmp.ne.s32.totalorder %s527_s1, %s314_s21  ;;  %p318_p1 = scmp.lt.u32.totalorder %s314_s21, %s527_s1 }
   0x8   :  { %p320_p2 = pnand %p318_p1, %p315_p0 }
   0xa   :  { %323 = shalt.err (!%p320_p2)
}
   0xb   :  { %s324_s26 = scalar_lea.vmem %s30_s16, 64  ;;  %p329_p4 = scmp.lt.s32.totalorder %s30_s16, %s30_s16 }
   0xc   :  { %p325_p3 = scmp.ne.s32.totalorder %s30_s16, %s324_s26  ;;  %p330_p5 = scmp.lt.s32.totalorder %s324_s26, %s324_s26 }
   0xe   :  { %p331_p6 = por %p330_p5, %p329_p4 }
  0x10   :  { %p332_p7 = pnand %p331_p6, %p325_p3 }
  0x12   :  { %335 = shalt.err (!%p332_p7)
}
  0x13   :  { %32 = dma.hbm_to_vmem [thread:$0]  %s527_s1, 64, %s30_s16, [#allocation6]  }
  0x14   :  { %s336_s5 = scalar_lea.hbm %s526_s0, 64 }
  0x15   :  { %p337_p8 = scmp.ne.s32.totalorder %s526_s0, %s336_s5  ;;  %p340_p9 = scmp.lt.u32.totalorder %s336_s5, %s526_s0 }
  0x17   :  { %p342_p10 = pnand %p340_p9, %p337_p8 }
  0x19   :  { %345 = shalt.err (!%p342_p10)
}
  0x1a   :  { %s346_s10 = scalar_lea.vmem %s20_s18, 64  ;;  %p351_p12 = scmp.lt.s32.totalorder %s20_s18, %s20_s18 }
  0x1b   :  { %p347_p11 = scmp.ne.s32.totalorder %s20_s18, %s346_s10  ;;  %p352_p13 = scmp.lt.s32.totalorder %s346_s10, %s346_s10 }
  0x1d   :  { %p353_p0 = por %p352_p13, %p351_p12 }
  0x1f   :  { %p354_p1 = pnand %p353_p0, %p347_p11 }
  0x21   :  { %357 = shalt.err (!%p354_p1)
}
  0x22   :  { %22 = dma.hbm_to_vmem [thread:$0]  %s526_s0, 64, %s20_s18, [#allocation3]  }
  0x23   :  { %s434_s12 = smov [#allocation7]   ;;  %s358_s16 = scalar_lea.hbm %s528_s2, 1024 }
  0x24   :  { %s38_s13 = sshll.u32 %s434_s12, 4  ;;  %p359_p2 = scmp.ne.s32.totalorder %s528_s2, %s358_s16  ;;  %s39_s13 = int_to_ptr.vmem [resolvable:$true] %s38_s13 }
  0x25   :  { %p362_p3 = scmp.lt.u32.totalorder %s358_s16, %s528_s2 }
  0x27   :  { %p364_p4 = pnand %p362_p3, %p359_p2 }
  0x29   :  { %367 = shalt.err (!%p364_p4)
}
  0x2a   :  { %s368_s22 = scalar_lea.vmem %s39_s13, 1024  ;;  %p373_p6 = scmp.lt.s32.totalorder %s39_s13, %s39_s13 }
  0x2b   :  { %p369_p5 = scmp.ne.s32.totalorder %s39_s13, %s368_s22  ;;  %p374_p7 = scmp.lt.s32.totalorder %s368_s22, %s368_s22 }
  0x2d   :  { %p375_p8 = por %p374_p7, %p373_p6 }
  0x2f   :  { %p376_p9 = pnand %p375_p8, %p369_p5 }
  0x31   :  { %379 = shalt.err (!%p376_p9)
}
  0x32   :  { %s435_s0 = smov 64   ;;  %s436_s18 = smov 4  }
  0x33   :  { %44 = dma.hbm_to_vmem [thread:$0]  %s528_s2, 1024, %s39_s13, [#allocation6], %s435_s0, %s435_s0, %s436_s18  }
  0x34   :  { %s437_s25 = smov [#allocation8]   ;;  %s380_s29 = scalar_lea.hbm %s529_s3, 16 }
  0x35   :  { %s51_s26 = sshll.u32 %s437_s25, 4  ;;  %p381_p10 = scmp.ne.s32.totalorder %s529_s3, %s380_s29  ;;  %s52_s26 = int_to_ptr.vmem [resolvable:$true] %s51_s26 }
  0x36   :  { %p384_p11 = scmp.lt.u32.totalorder %s380_s29, %s529_s3 }
  0x38   :  { %p386_p12 = pnand %p384_p11, %p381_p10 }
  0x3a   :  { %389 = shalt.err (!%p386_p12)
}
  0x3b   :  { %s390_s8 = scalar_lea.vmem %s52_s26, 16  ;;  %s394_s2 = scalar_lea.vmem %s52_s26, 32 }
  0x3c   :  { %p391_p13 = scmp.ne.s32.totalorder %s52_s26, %s390_s8  ;;  %p395_p0 = scmp.lt.s32.totalorder %s52_s26, %s52_s26 }
  0x3d   :  { %p396_p1 = scmp.lt.s32.totalorder %s394_s2, %s390_s8 }
  0x3f   :  { %p397_p2 = por %p396_p1, %p395_p0 }
  0x41   :  { %p398_p3 = pnand %p397_p2, %p391_p13 }
  0x43   :  { %401 = shalt.err (!%p398_p3)
}
  0x44   :  { %54 = dma.hbm_to_vmem [thread:$0]  %s529_s3, 16, %s52_s26, [#allocation9]  }
  0x45   :  { %424 = dma.done.wait [#allocation3], 64  }
  0x46   :  { %425 = vsyncadd [#allocation3], 4294967232 }
  0x47   :  { %426 = dma.done.wait [#allocation6], 1088  }
  0x48   :  { %427 = vsyncadd [#allocation6], 4294966208 }
  0x49   :  { %428 = dma.done.wait [#allocation9], 16  }
  0x4a   :  { %429 = vsyncadd [#allocation9], 4294967280  ;;  %v438_v0 = vmov 0.0   ;;  %vm439_vm0 = vmmov 0   ;;  %vm74_vm1 = vcmask 1043456   ;;  %vm70_vm2 = vcmask 64512  }
  0x4b   :  { %271 = vmatprep.subr.bf16.mxu0 %v438_v0  ;;  %273 = vmatprep.mubr.msk.bf16.mxu0 %vm439_vm0, %v438_v0  ;;  %v69_v1 = vld [vmem:[#allocation5] sm:$0xf]  ;;  %v306_v3 = vld [vmem:[#allocation7] sm:$0xff]   ;;  %v68_v4 = vld [vmem:[#allocation2] sm:$0xf]  ;;  %s440_s3 = smov [#allocation10]  }
  0x4c   :  { %277 = vmatprep.subr.bf16.mxu1 %v438_v0  ;;  %293 = vmatprep.mubr.msk.bf16.mxu1 %vm439_vm0, %v438_v0  ;;  %v76_v2 = vsel %vm74_vm1, %v69_v1, 0  ;;  %v307_v5 = vld [vmem:[#allocation7 + $0x8] sm:$0xff]   ;;  %v308_v6 = vld [vmem:[#allocation7 + $0x10] sm:$0xff]   ;;  %v309_v7 = vld [vmem:[#allocation7 + $0x18] sm:$0xff]   ;;  %s239_s1 = sshll.u32 %s440_s3, 4  ;;  %s240_s1 = int_to_ptr.vmem [resolvable:$true] %s239_s1 }
  0x4d   :  { %272 = vmatpush3.bf16.msra.mxu0 %v76_v2  ;;  %278 = vmatpush3.bf16.msra.mxu1 %v306_v3  ;;  %v310_v8 = vld [vmem:[#allocation7 + $0x20] sm:$0xff]   ;;  %v311_v9 = vld [vmem:[#allocation7 + $0x28] sm:$0xff]   ;;  %v312_v10 = vld [vmem:[#allocation7 + $0x30] sm:$0xff]   ;;  %s402_s11 = scalar_lea.vmem %s240_s1, 64  ;;  %p407_p5 = scmp.lt.s32.totalorder %s240_s1, %s240_s1 }
  0x4e   :  { %279 = vmatprep.subr.bf16.mxu1 %v438_v0  ;;  %v313_v11 = vld [vmem:[#allocation7 + $0x38] sm:$0xff]   ;;  %v251_v17 = vld [vmem:[#allocation8] ss:$0 sm:$0xff]  ;;  %p403_p4 = scmp.ne.s32.totalorder %s240_s1, %s402_s11  ;;  %p408_p6 = scmp.lt.s32.totalorder %s402_s11, %s402_s11 }
  0x50   :  { %274 = vmatmul.mubr.msk.bf16.vlgmr.msra.gmra.mrb[0].mxu0 %vm70_vm2, %v68_v4  ;;  %p409_p7 = por %p408_p6, %p407_p5 }
  0x51   :  { %280 = vmatpush3.bf16.msra.mxu1 %v307_v5 }
  0x52   :  { %281 = vmatprep.subr.bf16.mxu1 %v438_v0  ;;  %p410_p8 = pnand %p409_p7, %p403_p4 }
  0x55   :  { %282 = vmatpush3.bf16.msra.mxu1 %v308_v6 }
  0x56   :  { %283 = vmatprep.subr.bf16.mxu1 %v438_v0 }
  0x59   :  { %284 = vmatpush3.bf16.msra.mxu1 %v309_v7 }
  0x5a   :  { %285 = vmatprep.subr.bf16.mxu1 %v438_v0 }
  0x5d   :  { %286 = vmatpush3.bf16.msra.mxu1 %v310_v8 }
  0x5e   :  { %287 = vmatprep.subr.bf16.mxu1 %v438_v0 }
  0x61   :  { %288 = vmatpush3.bf16.msra.mxu1 %v311_v9 }
  0x62   :  { %289 = vmatprep.subr.bf16.mxu1 %v438_v0 }
  0x65   :  { %290 = vmatpush3.bf16.msra.mxu1 %v312_v10 }
  0x66   :  { %291 = vmatprep.subr.bf16.mxu1 %v438_v0 }
  0x69   :  { %292 = vmatpush3.bf16.msra.mxu1 %v313_v11 }
 0x123   :  { %v112_v12 = vpop.f32.mrb[0].mxu0 }
 0x124   :  { %v118_v13 = vpack.c.bf16 %v112_v12, %v112_v12  ;;  %v275_v14 = vpop.f32.mrb[1].mxu0 }
 0x125   :  { %v115_v15 = vpop.f32.mrb[2].mxu0 }
 0x126   :  { %v276_v16 = vpop.f32.mrb[3].mxu0  ;;  %294 = vmatmul.mubr.bf16.vlgmr.msra.gmra.mrb[0].mxu1 %v118_v13 }
 0x1f9   :  { %v224_v18 = vpop.f32.mrb[0].mxu1 }
 0x1fa   :  { %v225_v19 = vadd.f32 %v251_v17, %v224_v18  ;;  %v295_v20 = vpop.f32.mrb[1].mxu1 }
 0x1fb   :  { %v227_v21 = vpop.f32.mrb[2].mxu1 }
 0x1fc   :  { %v230_v22 = vmax.f32 %v225_v19, 0.0  ;;  %v296_v23 = vpop.f32.mrb[3].mxu1 }
 0x1fe   :  { %v231_v24 = vpack.c.bf16 %v230_v22, %v230_v22 }
 0x200   :  { %232 = vst [vmem:[#allocation10] sm:$0xf] %v231_v24 }
 0x201   :  { %413 = shalt.err (!%p410_p8)
}
 0x202   :  { %s414_s14 = scalar_lea.hbm %s530_s4, 64 }
 0x203   :  { %p415_p9 = scmp.ne.s32.totalorder %s530_s4, %s414_s14  ;;  %p418_p10 = scmp.lt.u32.totalorder %s414_s14, %s530_s4 }
 0x205   :  { %p420_p11 = pnand %p418_p10, %p415_p9 }
 0x207   :  { %423 = shalt.err (!%p420_p11)
}
 0x208   :  { %242 = dma.vmem_to_hbm [thread:$0]  %s240_s1, 64, %s530_s4, [#allocation4]  }
 0x209   :  { %430 = dma.done.wait [#allocation4], 64  }
 0x20a   :  { %431 = vsyncadd [#allocation4], 4294967232 }
 0x20b   :  { %246 = vsyncpa [#allocation3], 1 }
 0x20c   :  { %247 = vsyncpa [#allocation6], 1 }
 0x20d   :  { %248 = vsyncpa [#allocation9], 1 }
 0x20e   :  { %249 = vsyncpa [#allocation4], 1 }

</bundles_post_ra>
